<compile_context>
chip_gen: v7x
topology: tpu7x:2x2x1
jax: 0.10.0
libtpu: 0.0.40
codegen_flags: <defaults>
</compile_context>

<pallas_src>
import functools

import jax
import jax.numpy as jnp
import numpy as np
from jax.experimental import pallas as pl
from jax.experimental.pallas import tpu as pltpu

POINTS = 3
C_IN = 3
C1 = 8
C2 = 16
CK = 2 * POINTS          # Kmap channels
CA = POINTS              # Amap channels
CH = CK + CA             # fused head channels (9)
OUT_ROWS = 16            # padded output rows (>= CH, multiple of 8)
OUT_LANES = 128          # lane-dense packed output


# --------------------------------------------------------------------------
# Pallas kernel: one (batch b, pixel-tile t) grid step.
# --------------------------------------------------------------------------
def curve_kernel(x_ref, w1_ref, b1_ref, w2_ref, b2_ref, wh_ref, bh_ref,
                 out_ref, acc_ref, *, inv_hw):
    """x_ref  : (27, TILE_P) bf16 transposed im2col patches (pixels on lanes)
       w*_ref : folded conv weights (bf16); biases as f32 columns
       out_ref: (OUT_ROWS, OUT_LANES) f32; written once per batch at t==last
       acc_ref: (CH, 1) f32 running per-channel sum of the sigmoid maps."""
    t = pl.program_id(1)

    @pl.when(t == 0)
    def _init():
        acc_ref[...] = jnp.zeros_like(acc_ref)

    xt = x_ref[...]                                              # (27, TILE_P)

    # conv1 (3x3 as im2col matmul) + ReLU                    -> (C1, TILE_P)
    h1 = jnp.dot(w1_ref[...], xt, preferred_element_type=jnp.float32)
    h1 = jnp.maximum(h1 + b1_ref[...], 0.0)

    # conv2 (1x1) + ReLU                                      -> (C2, TILE_P)
    h2 = jnp.dot(w2_ref[...], h1.astype(jnp.bfloat16),
                 preferred_element_type=jnp.float32)
    h2 = jnp.maximum(h2 + b2_ref[...], 0.0)

    # fused sigmoid heads: rows 0:6 = Kmap, rows 6:9 = Amap   -> (CH, TILE_P)
    g = jnp.dot(wh_ref[...], h2.astype(jnp.bfloat16),
                preferred_element_type=jnp.float32) + bh_ref[...]
    s = pl.reciprocal(1.0 + jnp.exp(-g), approx=True)            # sigmoid (EUP)

    # per-batch running channel sums (cross-lane reduce -> (CH, 1))
    acc_ref[...] += jnp.sum(s, axis=1, keepdims=True)

    @pl.when(t == pl.num_programs(1) - 1)
    def _finalize():
        m = acc_ref[...] * inv_hw                                # channel means

        def sort3(v):                        # v: (3, 1); ascending along rows
            x0, x1, x2 = v[0:1], v[1:2], v[2:3]
            lo, hi = jnp.minimum(x0, x1), jnp.maximum(x0, x1)
            mid, top = jnp.minimum(hi, x2), jnp.maximum(hi, x2)
            bot, mid2 = jnp.minimum(lo, mid), jnp.maximum(lo, mid)
            return jnp.concatenate([bot, mid2, top], axis=0)

        xs = sort3(m[0:POINTS])                                  # (3, 1)
        ys = sort3(m[POINTS:2 * POINTS])                         # (3, 1)
        a = (m[2 * POINTS:CH] - 0.5) * 80.0                      # (3, 1)
        a = jnp.where(a == 0.0, jnp.float32(1e-6), a)

        res = jnp.concatenate(
            [xs, ys, a, jnp.zeros((OUT_ROWS - CH, 1), jnp.float32)], axis=0)
        # single unmasked lane-dense store per batch
        out_ref[...] = jnp.broadcast_to(res, (OUT_ROWS, OUT_LANES))


# --------------------------------------------------------------------------
# Wrapper glue.
# --------------------------------------------------------------------------
def _pick_tile(hw, cap):
    """Largest pixel-tile dividing hw, preferring multiples of 128, <= cap."""
    best = 0
    t = 128
    while t <= min(hw, cap):
        if hw % t == 0:
            best = t
        t += 128
    if best:
        return best
    for t in range(min(hw, cap), 0, -1):
        if hw % t == 0:
            return t
    return hw


def _im2col_3x3_same(x_nhwc):
    B, H, W, C = x_nhwc.shape
    xp = jnp.pad(x_nhwc, ((0, 0), (1, 1), (1, 1), (0, 0)))
    cols = [xp[:, dy:dy + H, dx:dx + W, :] for dy in range(3) for dx in range(3)]
    patches = jnp.concatenate(cols, axis=-1)          # (B, H, W, 9*C), (dy,dx,ci)
    return patches.reshape(B, H * W, 9 * C)


@functools.partial(jax.jit, static_argnames=("tile_p",))
def curve_model_forward(I_nchw, params, tile_p=None):
    """I_nchw: (B, 3, H, W) float32, like the PyTorch module input."""
    w1, b1, w2, b2, wk, bk, wa, ba = params
    B, Cin, H, W = I_nchw.shape
    assert Cin == C_IN
    hw = H * W
    # Tile cap of 4096 pixel-columns keeps per-step VMEM small even on v7x's
    # tighter 64 MiB budget; v5e/v6e could go larger but this is ample here.
    tile = tile_p if tile_p is not None else _pick_tile(hw, 4096)
    assert hw % tile == 0
    n_t = hw // tile

    # Dominant HBM stream: bf16, transposed im2col (pixels on lanes).
    x_nhwc = jnp.transpose(I_nchw, (0, 2, 3, 1)).astype(jnp.float32)
    patches = _im2col_3x3_same(x_nhwc)                            # (B, HW, 27)
    xcol_t = (patches.astype(jnp.bfloat16)
              .reshape(B, n_t, tile, 9 * C_IN)
              .transpose(0, 1, 3, 2))                             # (B, n_t, 27, tile)

    # Fold weights to (Cout, Cin) matmul form (bf16); heads fused; f32 biases.
    w1m = w1.T.astype(jnp.bfloat16)                               # (C1, 27)
    w2m = w2.T.astype(jnp.bfloat16)                               # (C2, C1)
    whm = jnp.concatenate([wk.T, wa.T], axis=0).astype(jnp.bfloat16)  # (CH, C2)
    b1c = b1.reshape(C1, 1).astype(jnp.float32)
    b2c = b2.reshape(C2, 1).astype(jnp.float32)
    bhc = jnp.concatenate([bk, ba], axis=1).reshape(CH, 1).astype(jnp.float32)

    kernel = functools.partial(curve_kernel, inv_hw=1.0 / float(hw))

    packed = pl.pallas_call(
        kernel,
        out_shape=jax.ShapeDtypeStruct((B, OUT_ROWS, OUT_LANES), jnp.float32),
        grid=(B, n_t),
        in_specs=[
            pl.BlockSpec((None, None, 9 * C_IN, tile), lambda b, t: (b, t, 0, 0)),
            pl.BlockSpec((C1, 9 * C_IN), lambda b, t: (0, 0)),
            pl.BlockSpec((C1, 1), lambda b, t: (0, 0)),
            pl.BlockSpec((C2, C1), lambda b, t: (0, 0)),
            pl.BlockSpec((C2, 1), lambda b, t: (0, 0)),
            pl.BlockSpec((CH, C2), lambda b, t: (0, 0)),
            pl.BlockSpec((CH, 1), lambda b, t: (0, 0)),
        ],
        out_specs=pl.BlockSpec((None, OUT_ROWS, OUT_LANES), lambda b, t: (b, 0, 0)),
        scratch_shapes=[pltpu.VMEM((CH, 1), jnp.float32)],
        compiler_params=pltpu.CompilerParams(
            dimension_semantics=("parallel", "arbitrary")),
    )(xcol_t, w1m, b1c, w2m, b2c, whm, bhc)

    res = packed[:, :, 0]                                          # (B, OUT_ROWS)
    return (res[:, 0:POINTS],
            res[:, POINTS:2 * POINTS],
            res[:, 2 * POINTS:CH])


# --------------------------------------------------------------------------
# Pure-JAX reference (sanity check).
# --------------------------------------------------------------------------
def reference_forward(I_nchw, params):
    w1, b1, w2, b2, wk, bk, wa, ba = params
    x = jnp.transpose(I_nchw, (0, 2, 3, 1)).astype(jnp.float32)    # NHWC
    w1_hwio = w1.reshape(3, 3, C_IN, C1)
    h1 = jax.lax.conv_general_dilated(
        x, w1_hwio, window_strides=(1, 1), padding="SAME",
        dimension_numbers=("NHWC", "HWIO", "NHWC"))
    h1 = jnp.maximum(h1 + b1.reshape(1, 1, 1, C1), 0.0)
    h2 = jnp.maximum(jnp.einsum("bhwc,cf->bhwf", h1, w2) + b2.reshape(1, 1, 1, C2), 0.0)
    kmap = jax.nn.sigmoid(jnp.einsum("bhwc,cf->bhwf", h2, wk) + bk.reshape(1, 1, 1, CK))
    amap = jax.nn.sigmoid(jnp.einsum("bhwc,cf->bhwf", h2, wa) + ba.reshape(1, 1, 1, CA))
    ps = jnp.mean(kmap, axis=(1, 2))                               # (B, 6)
    am = jnp.mean(amap, axis=(1, 2))                               # (B, 3)
    xs = jnp.sort(ps[:, :POINTS], axis=1)
    ys = jnp.sort(ps[:, POINTS:2 * POINTS], axis=1)
    a_out = (am - 0.5) * 80.0
    a_out = jnp.where(a_out == 0.0, 1e-6, a_out)
    return xs, ys, a_out


def init_params(key):
    ks = jax.random.split(key, 8)
    scale = 0.2
    w1 = scale * jax.random.normal(ks[0], (9 * C_IN, C1), jnp.float32)
    b1 = scale * jax.random.normal(ks[1], (1, C1), jnp.float32)
    w2 = scale * jax.random.normal(ks[2], (C1, C2), jnp.float32)
    b2 = scale * jax.random.normal(ks[3], (1, C2), jnp.float32)
    wk = scale * jax.random.normal(ks[4], (C2, CK), jnp.float32)
    bk = scale * jax.random.normal(ks[5], (1, CK), jnp.float32)
    wa = scale * jax.random.normal(ks[6], (C2, CA), jnp.float32)
    ba = scale * jax.random.normal(ks[7], (1, CA), jnp.float32)
    return (w1, b1, w2, b2, wk, bk, wa, ba)


if __name__ == "__main__":
    root = jax.random.PRNGKey(0)
    k_in, k_par = jax.random.split(root)

    B, H, W = 2, 16, 16
    I = jax.random.uniform(k_in, (B, C_IN, H, W), jnp.float32)     # NCHW in [0,1]
    params = init_params(k_par)

    # tile_p=128 -> 2 pixel tiles per image: exercises the grid accumulator.
    xs, ys, as_ = curve_model_forward(I, params, tile_p=128)
    jax.block_until_ready((xs, ys, as_))

    # Sanity check against a pure-JAX reference evaluated on the same
    # bf16-rounded image/weights the kernel consumes (isolates kernel error
    # from the intentional bf16 storage quantization).
    q = lambda a: a.astype(jnp.bfloat16).astype(jnp.float32)
    I_q = q(I)
    params_q = tuple(q(p) for p in params)
    rxs, rys, ras = reference_forward(I_q, params_q)
    np.testing.assert_allclose(np.asarray(xs), np.asarray(rxs), rtol=2e-2, atol=2e-2)
    np.testing.assert_allclose(np.asarray(ys), np.asarray(rys), rtol=2e-2, atol=2e-2)
    np.testing.assert_allclose(np.asarray(as_), np.asarray(ras), rtol=5e-2, atol=5e-1)

    print("KERNEL_OK")
</pallas_src>

<mosaic_0001>
module attributes {stable_mosaic.version = 11 : i64} {
  func.func @curve_kernel(%arg0: i32, %arg1: i32, %arg2: memref<1x1x27x128xbf16, #tpu.memory_space<vmem>>, %arg3: memref<8x27xbf16, #tpu.memory_space<vmem>>, %arg4: memref<8x1xf32, #tpu.memory_space<vmem>>, %arg5: memref<16x8xbf16, #tpu.memory_space<vmem>>, %arg6: memref<16x1xf32, #tpu.memory_space<vmem>>, %arg7: memref<9x16xbf16, #tpu.memory_space<vmem>>, %arg8: memref<9x1xf32, #tpu.memory_space<vmem>>, %arg9: memref<1x16x128xf32, #tpu.memory_space<vmem>>, %arg10: memref<9x1xf32, #tpu.memory_space<vmem>>) attributes {dimension_semantics = [#tpu.dimension_semantics<parallel>, #tpu.dimension_semantics<arbitrary>], iteration_bounds = array<i64: 2, 2>, scalar_prefetch = 0 : i64, scratch_operands = 1 : i64, tpu.core_type = #tpu.core_type<tc>, window_params = [{transform_indices = @transform_0, window_bounds = array<i64: 1, 1, 27, 128>}, {pipeline_mode = #tpu.pipeline_mode<synchronous>, transform_indices = @transform_1, window_bounds = array<i64: 8, 27>}, {pipeline_mode = #tpu.pipeline_mode<synchronous>, transform_indices = @transform_2, window_bounds = array<i64: 8, 1>}, {pipeline_mode = #tpu.pipeline_mode<synchronous>, transform_indices = @transform_3, window_bounds = array<i64: 16, 8>}, {pipeline_mode = #tpu.pipeline_mode<synchronous>, transform_indices = @transform_4, window_bounds = array<i64: 16, 1>}, {pipeline_mode = #tpu.pipeline_mode<synchronous>, transform_indices = @transform_5, window_bounds = array<i64: 9, 16>}, {pipeline_mode = #tpu.pipeline_mode<synchronous>, transform_indices = @transform_6, window_bounds = array<i64: 9, 1>}, {transform_indices = @transform_7, window_bounds = array<i64: 1, 16, 128>}]} {
    %c0_i32 = arith.constant 0 : i32
    %0 = arith.cmpi eq, %arg1, %c0_i32 : i32
    %1 = arith.extui %0 : i1 to i32
    %c0_i32_0 = arith.constant 0 : i32
    %2 = arith.cmpi ne, %1, %c0_i32_0 : i32
    scf.if %2 {
      %cst_28 = arith.constant 0.000000e+00 : f32
      %40 = vector.broadcast %cst_28 : f32 to vector<9x1xf32>
      %c0_29 = arith.constant 0 : index
      %c0_30 = arith.constant 0 : index
      %41 = vector.load %arg10[%c0_29, %c0_30] : memref<9x1xf32, #tpu.memory_space<vmem>>, vector<9x1xf32>
      tpu.vector_store %arg10[%c0_29, %c0_30], %40 {strides = array<i32>} : memref<9x1xf32, #tpu.memory_space<vmem>>, vector<9x1xf32>,
    } else {
    }
    %c0 = arith.constant 0 : index
    %c0_1 = arith.constant 0 : index
    %c0_2 = arith.constant 0 : index
    %c0_3 = arith.constant 0 : index
    %3 = vector.load %arg2[%c0, %c0_1, %c0_2, %c0_3] : memref<1x1x27x128xbf16, #tpu.memory_space<vmem>>, vector<1x1x27x128xbf16>
    %4 = vector.shape_cast %3 : vector<1x1x27x128xbf16> to vector<27x128xbf16>
    %c0_4 = arith.constant 0 : index
    %c0_5 = arith.constant 0 : index
    %5 = vector.load %arg3[%c0_4, %c0_5] : memref<8x27xbf16, #tpu.memory_space<vmem>>, vector<8x27xbf16>
    %cst = arith.constant dense<0.000000e+00> : vector<8x128xf32>
    %6 = tpu.matmul %5, %4, %cst {dimension_numbers = #tpu.dot_dimension_numbers<[1], [0], [0], [1], [0, 0, 1, 1], [], []>} : vector<8x27xbf16>, vector<27x128xbf16>, vector<8x128xf32> -> vector<8x128xf32>
    %c0_6 = arith.constant 0 : index
    %c0_7 = arith.constant 0 : index
    %7 = vector.load %arg4[%c0_6, %c0_7] : memref<8x1xf32, #tpu.memory_space<vmem>>, vector<8x1xf32>
    %8 = vector.broadcast %7 : vector<8x1xf32> to vector<8x128xf32>
    %9 = arith.addf %6, %8 : vector<8x128xf32>
    %cst_8 = arith.constant 0.000000e+00 : f32
    %10 = vector.broadcast %cst_8 : f32 to vector<8x128xf32>
    %11 = arith.maximumf %9, %10 : vector<8x128xf32>
    %c0_9 = arith.constant 0 : index
    %c0_10 = arith.constant 0 : index
    %12 = vector.load %arg5[%c0_9, %c0_10] : memref<16x8xbf16, #tpu.memory_space<vmem>>, vector<16x8xbf16>
    %13 = arith.truncf %11 : vector<8x128xf32> to vector<8x128xbf16>
    %cst_11 = arith.constant dense<0.000000e+00> : vector<16x128xf32>
    %14 = tpu.matmul %12, %13, %cst_11 {dimension_numbers = #tpu.dot_dimension_numbers<[1], [0], [0], [1], [0, 0, 1, 1], [], []>} : vector<16x8xbf16>, vector<8x128xbf16>, vector<16x128xf32> -> vector<16x128xf32>
    %c0_12 = arith.constant 0 : index
    %c0_13 = arith.constant 0 : index
    %15 = vector.load %arg6[%c0_12, %c0_13] : memref<16x1xf32, #tpu.memory_space<vmem>>, vector<16x1xf32>
    %16 = vector.broadcast %15 : vector<16x1xf32> to vector<16x128xf32>
    %17 = arith.addf %14, %16 : vector<16x128xf32>
    %cst_14 = arith.constant 0.000000e+00 : f32
    %18 = vector.broadcast %cst_14 : f32 to vector<16x128xf32>
    %19 = arith.maximumf %17, %18 : vector<16x128xf32>
    %c0_15 = arith.constant 0 : index
    %c0_16 = arith.constant 0 : index
    %20 = vector.load %arg7[%c0_15, %c0_16] : memref<9x16xbf16, #tpu.memory_space<vmem>>, vector<9x16xbf16>
    %21 = arith.truncf %19 : vector<16x128xf32> to vector<16x128xbf16>
    %cst_17 = arith.constant dense<0.000000e+00> : vector<9x128xf32>
    %22 = tpu.matmul %20, %21, %cst_17 {dimension_numbers = #tpu.dot_dimension_numbers<[1], [0], [0], [1], [0, 0, 1, 1], [], []>} : vector<9x16xbf16>, vector<16x128xbf16>, vector<9x128xf32> -> vector<9x128xf32>
    %c0_18 = arith.constant 0 : index
    %c0_19 = arith.constant 0 : index
    %23 = vector.load %arg8[%c0_18, %c0_19] : memref<9x1xf32, #tpu.memory_space<vmem>>, vector<9x1xf32>
    %24 = vector.broadcast %23 : vector<9x1xf32> to vector<9x128xf32>
    %25 = arith.addf %22, %24 : vector<9x128xf32>
    %cst_20 = arith.constant 0.000000e+00 : f32
    %26 = vector.broadcast %cst_20 : f32 to vector<9x128xf32>
    %27 = arith.subf %26, %25 : vector<9x128xf32>
    %28 = math.exp %27 : vector<9x128xf32>
    %cst_21 = arith.constant 1.000000e+00 : f32
    %29 = vector.broadcast %cst_21 : f32 to vector<9x128xf32>
    %30 = arith.addf %29, %28 : vector<9x128xf32>
    %31 = tpu.reciprocal %30 {approx = true} : vector<9x128xf32> -> vector<9x128xf32>
    %c0_22 = arith.constant 0 : index
    %c0_23 = arith.constant 0 : index
    %32 = vector.load %arg10[%c0_22, %c0_23] : memref<9x1xf32, #tpu.memory_space<vmem>>, vector<9x1xf32>
    %cst_24 = arith.constant dense<0.000000e+00> : vector<9xf32>
    %33 = vector.multi_reduction <add>, %31, %cst_24 [1] : vector<9x128xf32> to vector<9xf32>
    %34 = vector.shape_cast %33 : vector<9xf32> to vector<9x1xf32>
    %35 = arith.addf %32, %34 : vector<9x1xf32>
    %c0_25 = arith.constant 0 : index
    %c0_26 = arith.constant 0 : index
    %36 = vector.load %arg10[%c0_25, %c0_26] : memref<9x1xf32, #tpu.memory_space<vmem>>, vector<9x1xf32>
    tpu.vector_store %arg10[%c0_25, %c0_26], %35 {strides = array<i32>} : memref<9x1xf32, #tpu.memory_space<vmem>>, vector<9x1xf32>,
    %c1_i32 = arith.constant 1 : i32
    %37 = arith.cmpi eq, %arg1, %c1_i32 : i32
    %38 = arith.extui %37 : i1 to i32
    %c0_i32_27 = arith.constant 0 : i32
    %39 = arith.cmpi ne, %38, %c0_i32_27 : i32
    scf.if %39 {
      %c0_28 = arith.constant 0 : index
      %c0_29 = arith.constant 0 : index
      %40 = vector.load %arg10[%c0_28, %c0_29] : memref<9x1xf32, #tpu.memory_space<vmem>>, vector<9x1xf32>
      %cst_30 = arith.constant 3.906250e-03 : f32
      %41 = vector.broadcast %cst_30 : f32 to vector<9x1xf32>
      %42 = arith.mulf %40, %41 : vector<9x1xf32>
      %43 = vector.extract_strided_slice %42 {offsets = [0, 0], sizes = [3, 1], strides = [1, 1]} : vector<9x1xf32> to vector<3x1xf32>
      %44 = vector.extract_strided_slice %43 {offsets = [0, 0], sizes = [1, 1], strides = [1, 1]} : vector<3x1xf32> to vector<1x1xf32>
      %45 = vector.extract_strided_slice %43 {offsets = [1, 0], sizes = [1, 1], strides = [1, 1]} : vector<3x1xf32> to vector<1x1xf32>
      %46 = vector.extract_strided_slice %43 {offsets = [2, 0], sizes = [1, 1], strides = [1, 1]} : vector<3x1xf32> to vector<1x1xf32>
      %47 = arith.minimumf %44, %45 : vector<1x1xf32>
      %48 = arith.maximumf %44, %45 : vector<1x1xf32>
      %49 = arith.minimumf %48, %46 : vector<1x1xf32>
      %50 = arith.maximumf %48, %46 : vector<1x1xf32>
      %51 = arith.minimumf %47, %49 : vector<1x1xf32>
      %52 = arith.maximumf %47, %49 : vector<1x1xf32>
      %53 = tpu.concatenate %51, %52, %50 in 0 : vector<1x1xf32>, vector<1x1xf32>, vector<1x1xf32> -> vector<3x1xf32>
      %54 = vector.extract_strided_slice %42 {offsets = [3, 0], sizes = [3, 1], strides = [1, 1]} : vector<9x1xf32> to vector<3x1xf32>
      %55 = vector.extract_strided_slice %54 {offsets = [0, 0], sizes = [1, 1], strides = [1, 1]} : vector<3x1xf32> to vector<1x1xf32>
      %56 = vector.extract_strided_slice %54 {offsets = [1, 0], sizes = [1, 1], strides = [1, 1]} : vector<3x1xf32> to vector<1x1xf32>
      %57 = vector.extract_strided_slice %54 {offsets = [2, 0], sizes = [1, 1], strides = [1, 1]} : vector<3x1xf32> to vector<1x1xf32>
      %58 = arith.minimumf %55, %56 : vector<1x1xf32>
      %59 = arith.maximumf %55, %56 : vector<1x1xf32>
      %60 = arith.minimumf %59, %57 : vector<1x1xf32>
      %61 = arith.maximumf %59, %57 : vector<1x1xf32>
      %62 = arith.minimumf %58, %60 : vector<1x1xf32>
      %63 = arith.maximumf %58, %60 : vector<1x1xf32>
      %64 = tpu.concatenate %62, %63, %61 in 0 : vector<1x1xf32>, vector<1x1xf32>, vector<1x1xf32> -> vector<3x1xf32>
      %65 = vector.extract_strided_slice %42 {offsets = [6, 0], sizes = [3, 1], strides = [1, 1]} : vector<9x1xf32> to vector<3x1xf32>
      %cst_31 = arith.constant 5.000000e-01 : f32
      %66 = vector.broadcast %cst_31 : f32 to vector<3x1xf32>
      %67 = arith.subf %65, %66 : vector<3x1xf32>
      %cst_32 = arith.constant 8.000000e+01 : f32
      %68 = vector.broadcast %cst_32 : f32 to vector<3x1xf32>
      %69 = arith.mulf %67, %68 : vector<3x1xf32>
      %cst_33 = arith.constant 0.000000e+00 : f32
      %70 = vector.broadcast %cst_33 : f32 to vector<3x1xf32>
      %71 = arith.cmpf oeq, %69, %70 : vector<3x1xf32>
      %cst_34 = arith.constant 9.99999997E-7 : f32
      %72 = vector.broadcast %cst_34 : f32 to vector<3x1xf32>
      %73 = arith.select %71, %72, %69 : vector<3x1xi1>, vector<3x1xf32>
      %cst_35 = arith.constant 0.000000e+00 : f32
      %74 = vector.broadcast %cst_35 : f32 to vector<7x1xf32>
      %75 = tpu.concatenate %53, %64, %73, %74 in 0 : vector<3x1xf32>, vector<3x1xf32>, vector<3x1xf32>, vector<7x1xf32> -> vector<16x1xf32>
      %76 = vector.shape_cast %75 : vector<16x1xf32> to vector<16x1xf32>
      %77 = vector.broadcast %76 : vector<16x1xf32> to vector<16x128xf32>
      %c0_36 = arith.constant 0 : index
      %c0_37 = arith.constant 0 : index
      %c0_38 = arith.constant 0 : index
      %78 = vector.load %arg9[%c0_36, %c0_37, %c0_38] : memref<1x16x128xf32, #tpu.memory_space<vmem>>, vector<1x16x128xf32>
      %79 = vector.shape_cast %78 : vector<1x16x128xf32> to vector<16x128xf32>
      %80 = vector.shape_cast %77 : vector<16x128xf32> to vector<1x16x128xf32>
      tpu.vector_store %arg9[%c0_36, %c0_37, %c0_38], %80 {strides = array<i32>} : memref<1x16x128xf32, #tpu.memory_space<vmem>>, vector<1x16x128xf32>,
    } else {
    }
    return
  }
  func.func @transform_0(%arg0: i32, %arg1: i32) -> (i32, i32, i32, i32) {
    %c0_i32 = arith.constant 0 : i32
    %c0_i32_0 = arith.constant 0 : i32
    %c0_i32_1 = arith.constant 0 : i32
    return %arg0, %arg1, %c0_i32, %c0_i32_0 : i32, i32, i32, i32
  }
  func.func @transform_1(%arg0: i32, %arg1: i32) -> (i32, i32) {
    %c0_i32 = arith.constant 0 : i32
    %c0_i32_0 = arith.constant 0 : i32
    %c0_i32_1 = arith.constant 0 : i32
    return %c0_i32, %c0_i32_0 : i32, i32
  }
  func.func @transform_2(%arg0: i32, %arg1: i32) -> (i32, i32) {
    %c0_i32 = arith.constant 0 : i32
    %c0_i32_0 = arith.constant 0 : i32
    %c0_i32_1 = arith.constant 0 : i32
    return %c0_i32, %c0_i32_0 : i32, i32
  }
  func.func @transform_3(%arg0: i32, %arg1: i32) -> (i32, i32) {
    %c0_i32 = arith.constant 0 : i32
    %c0_i32_0 = arith.constant 0 : i32
    %c0_i32_1 = arith.constant 0 : i32
    return %c0_i32, %c0_i32_0 : i32, i32
  }
  func.func @transform_4(%arg0: i32, %arg1: i32) -> (i32, i32) {
    %c0_i32 = arith.constant 0 : i32
    %c0_i32_0 = arith.constant 0 : i32
    %c0_i32_1 = arith.constant 0 : i32
    return %c0_i32, %c0_i32_0 : i32, i32
  }
  func.func @transform_5(%arg0: i32, %arg1: i32) -> (i32, i32) {
    %c0_i32 = arith.constant 0 : i32
    %c0_i32_0 = arith.constant 0 : i32
    %c0_i32_1 = arith.constant 0 : i32
    return %c0_i32, %c0_i32_0 : i32, i32
  }
  func.func @transform_6(%arg0: i32, %arg1: i32) -> (i32, i32) {
    %c0_i32 = arith.constant 0 : i32
    %c0_i32_0 = arith.constant 0 : i32
    %c0_i32_1 = arith.constant 0 : i32
    return %c0_i32, %c0_i32_0 : i32, i32
  }
  func.func @transform_7(%arg0: i32, %arg1: i32) -> (i32, i32, i32) {
    %c0_i32 = arith.constant 0 : i32
    %c0_i32_0 = arith.constant 0 : i32
    %c0_i32_1 = arith.constant 0 : i32
    return %arg0, %c0_i32, %c0_i32_0 : i32, i32, i32
  }
}

</mosaic_0001>

<bundles_post_ra>
// kernel: curve_model_forward.1
= control target key start
LH: loop header
LB: loop body
LE: loop exit
PB: predicated region body
PF: predicated region fallthrough
CT: control target
= control target key end

     0   :  { %s885_s24 = smov 0   ;;  %s887_s25 = smov 0   ;;  %s979_s0 = inlined_call_operand.vmem [shape: bf16[2,2,27,128], index: 0, kind: input, shape index: {}]   ;;  %s980_s1 = inlined_call_operand.vmem [shape: bf16[8,27], index: 1, kind: input, shape index: {}]   ;;  %s981_s2 = inlined_call_operand.vmem [shape: f32[8,1], index: 2, kind: input, shape index: {}]   ;;  %s982_s3 = inlined_call_operand.vmem [shape: bf16[16,8], index: 3, kind: input, shape index: {}]   ;;  %s983_s4 = inlined_call_operand.vmem [shape: f32[16,1], index: 4, kind: input, shape index: {}]   ;;  %s984_s5 = inlined_call_operand.vmem [shape: bf16[9,16], index: 5, kind: input, shape index: {}]   ;;  %s985_s6 = inlined_call_operand.vmem [shape: f32[9,1], index: 6, kind: input, shape index: {}]   ;;  %s986_s7 = inlined_call_operand.vmem [shape: f32[2,16,128], index: 7, kind: output, shape index: {}]  }
   0x1   :  { %s889_s26 = smov 0   ;;  %s891_s27 = smov 0  }
   0x2   :  { %s893_s28 = smov 0  }
   0x3 LB: > { %s26_s29 = sadd.s32 1, %s829_s26  ;;  %s29_s30 = sadd.s32 1, %s833_s27  ;;  %s837_s28 = sphi %s893_s28, %s17_s28   ;;  %s833_s27 = sphi %s891_s27, %s990_s27   ;;  %s829_s26 = sphi %s889_s26, %s989_s26   ;;  %s825_s25 = sphi %s887_s25, %s988_s25   ;;  %s821_s24 = sphi %s885_s24, %s987_s24  }
   0x4   : > { %p27_p0 = scmp.ge.s32.totalorder %s26_s29, 2  ;;  %p691_p1 = scmp.ge.s32.totalorder %s837_s28, 1 }
   0x5   : > { %p255_p2 = scmp.lt.s32.totalorder %s837_s28, 5 }
   0x6   : > { %s992_s29 = smov (%p27_p0, %s26_s29), 0  ;;  %s994_s30 = smov (!%p27_p0, %s29_s30), %s833_s27 }
   0x7   : > { %p256_p3 = pnand %p691_p1, %p255_p2  ;;  %p31_p4 = scmp.ge.s32.totalorder %s994_s30, 2 }
   0x8   : > { %p291_p5 = scmp.lt.s32.totalorder (!%p256_p3), %s825_s25, 1  ;;  %p293_p6 = scmp.lt.s32.totalorder (!%p256_p3), %s821_s24, 1 }
   0x9   : > { %s996_s30 = smov (%p31_p4, %s994_s30), 0  ;;  %259 = sbr.rel (%p256_p3) target bundleno = 1022 (0x3fe), region = 48 }
   0xa   : > { %p697_p7 = scmp.ne.s32.totalorder (!%p256_p3), %s821_s24, 0 }
  0x10   : > { %s998_s25 = smov (!%p291_p5, %s825_s25), 1  ;;  %309 = sbr.rel (%p697_p7) target bundleno = 23 (0x17), region = 52 }
  0x11   : > { %s294_s8 = scalar_select %p293_p6, %s821_s24, 1 }
  0x12   : > { %s693_s9 = sshll.u32 %s998_s25, 3  ;;  %s710_s10 = sshll.u32 %s998_s25, 4  ;;  %vm310_vm0 = vcmask (!%p697_p7), 7168   ;;  %vm312_vm1 = vcmask (!%p697_p7), 0   ;;  %v839_v0 = vmov (!%p697_p7), 0.0  }
  0x13   : > { %s692_s11 = sshll.u32 %s294_s8, 2  ;;  %s922_s14 = scalar_lea.vmem %s986_s7, %s710_s10  ;;  %311 = vst.msk [vmem:[#allocation2] sm:$0xff] (!%p697_p7), %vm310_vm0, %v839_v0 }
  0x14   : > { %s297_s15 = sadd.s32 %s693_s9, %s692_s11  ;;  %313 = vst.msk [vmem:[#allocation2 + $0x8] sm:$0x1] (!%p697_p7), %vm312_vm1, %v839_v0 }
  0x15   : > { %s694_s16 = sshll.u32 %s297_s15, 2 }
  0x16   : > { %s299_s19 = scalar_lea.vmem %s979_s0, %s694_s16 }
  0x17 PF: > { %v786_v1 = vld [vmem:[%s299_s19] sm:$0xff]   ;;  %v840_v2 = vmov 0.0   ;;  %v787_v3 = vld [vmem:[%s299_s19 + $0x8] sm:$0x3f]   ;;  %vm340_vm2 = vcmask 1044480   ;;  %vm341_vm3 = vcmask 1045504  }
  0x18   : > { %718 = vmatprep.subr.bf16.mxu0 %v840_v2  ;;  %726 = vmatprep.subr.bf16.mxu1 %v840_v2  ;;  %v841_v4 = vmov 65535   ;;  %vm842_vm4 = vmmov 0   ;;  %v319_v6 = vld [vmem:[%s981_s2] sm:$0xff]  ;;  %v843_v8 = vmov 0   ;;  %vm336_vm5 = vcmask 220160   ;;  %v392_v13 = vld [vmem:[%s983_s4 + $0x8] sm:$0xff] }
  0x19   : > { %719 = vmatpush3.bf16.msra.mxu0 %v786_v1  ;;  %v342_v5 = vsel %vm340_vm2, 4294967295, %v841_v4  ;;  %722 = vmatprep.mubr.msk.bf16.mxu0 %vm842_vm4, %v840_v2  ;;  %v391_v10 = vld [vmem:[%s983_s4] sm:$0xff]  ;;  %v463_v14 = vld [vmem:[%s985_s6 + $0x8] sm:$0x1]  ;;  %vm412_vm6 = vcmask 1043456   ;;  %vm408_vm7 = vcmask 64512  }
  0x1a   : > { %720 = vmatprep.subr.bf16.mxu0 %v840_v2  ;;  %v343_v7 = vsel %vm341_vm3, %v342_v5, 0  ;;  %784 = vset.pattern.permute.xlu0 %v843_v8  ;;  %v318_v11 = vld [vmem:[%s980_s1] sm:$0xf]  ;;  %vm479_vm8 = vcmask 130048   ;;  %vm538_vm9 = vcmask 1040384   ;;  %vm544_vm10 = vcmask 7168  }
  0x1b   : > { %728 = vmatprep.mubr.msk.bf16.mxu1 %vm842_vm4, %v840_v2  ;;  %v345_v9 = vand.u32 %v787_v3, %v343_v7  ;;  %322 = vperm.xlu0 %784, %v319_v6   ;;  %v462_v12 = vld [vmem:[%s985_s6] sm:$0xff]  ;;  %v535_v59 = vld [vmem:[#allocation2 + $0x8] sm:$0x1]  ;;  %vm546_vm11 = vcmask 0   ;;  %p705_p8 = scmp.ne.s32.totalorder %s821_s24, 1 }
  0x1c   : > { %785 = vset.pattern.permute.xlu1 %v843_v8  ;;  %v788_v24 = vld [vmem:[%s982_s3] sm:$0xff]   ;;  %v844_v0 = vmov (!%p705_p8), 0   ;;  %vm574_vm12 = vcmask (!%p705_p8), 1041408   ;;  %vm596_vm14 = vcmask (!%p705_p8), 1042432  }
  0x1d   : > { %721 = vmatpush3.bf16.msra.mxu0 %v345_v9  ;;  %400 = vperm.xlu1 %785, %v392_v13   ;;  %v789_v36 = vld [vmem:[%s984_s5] sm:$0x1f]  }
  0x1e   : > { %v534_v56 = vld [vmem:[#allocation2] sm:$0xff] }
  0x1f   : > { %395 = vperm.xlu0 %784, %v391_v10  }
  0x20   : > { %723 = vmatmul.mubr.msk.bf16.vlgmr.msra.gmra.mrb[0].mxu0 %vm336_vm5, %v318_v11 }
  0x21   : > { %471 = vperm.xlu1 %785, %v463_v14  }
  0x23   : > { %466 = vperm.xlu0 %784, %v462_v12  }
  0x27   : > { %798 = vset.pattern.permute.xlu0 (!%p705_p8), %v844_v0 }
  0x9a   : > { %v323_v15 = vpop.permute.xlu0 %322 }
  0x9c   : > { %v401_v29 = vpop.permute.xlu1 %400 }
  0x9e   : > { %v396_v25 = vpop.permute.xlu0 %395 }
  0xa0   : > { %v472_v41 = vpop.permute.xlu1 %471 }
  0xa2   : > { %v467_v37 = vpop.permute.xlu0 %466 }
  0xf3   : > { %v381_v16 = vpop.f32.mrb[0].mxu0 }
  0xf4   : > { %v382_v17 = vadd.f32 %v381_v16, %v323_v15  ;;  %v724_v18 = vpop.f32.mrb[1].mxu0 }
  0xf5   : > { %v384_v19 = vpop.f32.mrb[2].mxu0 }
  0xf6   : > { %v387_v20 = vmax.f32 %v382_v17, 0.0  ;;  %v725_v21 = vpop.f32.mrb[3].mxu0 }
  0xf8   : > { %v390_v22 = vpack.c.bf16 %v387_v20, %v387_v20 }
  0xfa   : > { %v414_v23 = vsel %vm412_vm6, %v390_v22, 0 }
  0xfb   : > { %727 = vmatpush3.bf16.msra.mxu1 %v414_v23 }
  0xfc   : > { %732 = vmatprep.subr.bf16.mxu1 %v840_v2 }
  0xfe   : > { %729 = vmatmul.mubr.msk.bf16.vlgmr.msra.gmra.mrb[0].mxu1 %vm408_vm7, %v788_v24 }
  0xff   : > { %734 = vmatprep.mubr.msk.bf16.mxu1 %vm842_vm4, %v840_v2 }
 0x1d1   : > { %v450_v26 = vpop.f32.mrb[0].mxu1 }
 0x1d2   : > { %v451_v27 = vadd.f32 %v450_v26, %v396_v25  ;;  %v730_v28 = vpop.f32.mrb[1].mxu1 }
 0x1d3   : > { %v453_v30 = vpop.f32.mrb[2].mxu1 }
 0x1d4   : > { %v454_v31 = vadd.f32 %v453_v30, %v401_v29  ;;  %v731_v32 = vpop.f32.mrb[3].mxu1  ;;  %v457_v33 = vmax.f32 %v451_v27, 0.0 }
 0x1d6   : > { %v458_v34 = vmax.f32 %v454_v31, 0.0 }
 0x1d8   : > { %v461_v35 = vpack.c.bf16 %v458_v34, %v457_v33 }
 0x1da   : > { %733 = vmatpush3.bf16.msra.mxu1 %v461_v35 }
 0x1dd   : > { %735 = vmatmul.mubr.msk.bf16.vlgmr.msra.gmra.mrb[4].mxu1 %vm479_vm8, %v789_v36 }
 0x2b0   : > { %v517_v38 = vpop.f32.mrb[4].mxu1 }
 0x2b1   : > { %v518_v39 = vadd.f32 %v517_v38, %v467_v37  ;;  %v736_v40 = vpop.f32.mrb[5].mxu1 }
 0x2b2   : > { %v520_v42 = vpop.f32.mrb[6].mxu1 }
 0x2b3   : > { %v524_v43 = vsub.f32 0.0, %v518_v39  ;;  %v521_v44 = vadd.f32 %v520_v42, %v472_v41  ;;  %v737_v45 = vpop.f32.mrb[7].mxu1 }
 0x2b5   : > { %v526_v46 = vmul.f32 1.442695, %v524_v43  ;;  %v525_v47 = vsub.f32 0.0, %v521_v44 }
 0x2b7   : > { %790 = vpow2.f32 %v526_v46  ;;  %v528_v48 = vmul.f32 1.442695, %v525_v47 }
 0x2b9   : > { %792 = vpow2.f32 %v528_v48 }
 0x2c1   : > { %v791_v49 = vpop.eup %790 }
 0x2c2   : > { %v530_v50 = vadd.f32 1.0, %v791_v49 }
 0x2c3   : > { %v793_v51 = vpop.eup %792 }
 0x2c4   : > { %794 = vrcp.f32 %v530_v50  ;;  %v531_v52 = vadd.f32 1.0, %v793_v51 }
 0x2c6   : > { %796 = vrcp.f32 %v531_v52 }
 0x2ce   : > { %v795_v53 = vpop.eup %794 }
 0x2cf   : > { %536 = vadd.xlane.f32.xlu1 %v795_v53 }
 0x2d0   : > { %v797_v54 = vpop.eup %796 }
 0x2d1   : > { %v539_v55 = vsel %vm538_vm9, %v797_v54, 0.0 }
 0x2d2   : > { %540 = vadd.xlane.f32.xlu0 %v539_v55 }
 0x35c   : > { %v537_v57 = vpop.xlane.xlu1 %536  ;;  %551 = sbr.rel (%p705_p8) target bundleno = 1022 (0x3fe), region = 56 }
 0x35d   : > { %v542_v58 = vadd.f32 %v537_v57, %v534_v56 }
 0x35f   : > { %545 = vst.msk [vmem:[#allocation2] sm:$0xff] %vm544_vm10, %v542_v58  ;;  %v541_v60 = vpop.xlane.xlu0 %540 }
 0x360   : > { %v543_v61 = vadd.f32 %v541_v60, %v535_v59 }
 0x362   : > { %547 = vst.msk [vmem:[#allocation2 + $0x8] sm:$0x1] %vm546_vm11, %v543_v61 }
 0x366   : > { %v552_v62 = vld [vmem:[#allocation2] sm:$0xff] }
 0x367   : > { %v554_v1 = vmul.f32 0.00390625, %v552_v62 }
 0x369   : > { %v553_v63 = vld [vmem:[#allocation2 + $0x8] sm:$0x1]  ;;  %v557_v3 = vrot.slane %v554_v1, 1  ;;  %v561_v4 = vrot.slane %v554_v1, 2  ;;  %v706_v5 = vadd.f32 -0.5, %v554_v1 }
 0x36a   : > { %v555_v2 = vmul.f32 0.00390625, %v553_v63 }
 0x36b   : > { %v559_v6 = vmin.f32 %v554_v1, %v557_v3  ;;  %v560_v7 = vmax.f32 %v554_v1, %v557_v3  ;;  %v587_v11 = vmul.f32 80.0, %v706_v5 }
 0x36c   : > { %v707_v8 = vadd.f32 -0.5, %v555_v2 }
 0x36d   : > { %v563_v9 = vmin.f32 %v560_v7, %v561_v4  ;;  %v564_v10 = vmax.f32 %v560_v7, %v561_v4  ;;  %vm589_vm13 = vcmp.eq.f32.partialorder %v587_v11, 0.0 }
 0x36e   : > { %v588_v16 = vmul.f32 80.0, %v707_v8  ;;  %v591_v24 = vsel %vm589_vm13, 1e-06, %v587_v11 }
 0x36f   : > { %v565_v12 = vmin.f32 %v559_v6, %v563_v9  ;;  %v566_v13 = vmax.f32 %v559_v6, %v563_v9  ;;  %v571_v14 = vrot.slane %v564_v10, 6  ;;  %v581_v15 = vrot.slane %v564_v10, 1 }
 0x370   : > { %vm590_vm15 = vcmp.eq.f32.partialorder %v588_v16, 0.0 }
 0x371   : > { %v568_v17 = vrot.slane %v566_v13, 7  ;;  %v577_v18 = vrot.slane %v565_v12, 3  ;;  %v579_v19 = vrot.slane %v566_v13, 2  ;;  %v592_v27 = vsel %vm590_vm15, 1e-06, %v588_v16 }
 0x372   : > { %v599_v29 = vsel %vm538_vm9, %v592_v27, 0.0 }
 0x373   : > { %v573_v20 = vsel %vm538_vm9, %v565_v12, %v568_v17  ;;  %v583_v21 = vsel %vm538_vm9, %v577_v18, %v579_v19 }
 0x374   : > { %v575_v22 = vsel %vm574_vm12, %v573_v20, %v571_v14  ;;  %v584_v23 = vsel %vm574_vm12, %v583_v21, %v581_v15 }
 0x375   : > { %v594_v25 = vrot.slane %v584_v23, 5 }
 0x377   : > { %v597_v26 = vsel %vm596_vm14, %v575_v22, %v594_v25 }
 0x378   : > { %v598_v28 = vsel %vm341_vm3, %v597_v26, %v591_v24 }
 0x379   : > { %602 = vperm.xlu0 %798, %v598_v28  }
 0x37d   : > { %607 = vperm.xlu0 %798, %v599_v29  }
 0x3f8   : > { %v603_v30 = vpop.permute.xlu0 %602 }
 0x3f9   : > { %610 = vst [vmem:[%s922_s14] sm:$0xff] %v603_v30 }
 0x3fc   : > { %v608_v31 = vpop.permute.xlu0 %607 }
 0x3fd   : > { %611 = vst [vmem:[%s922_s14 + $0x8] sm:$0xff] %v608_v31 }
 0x3fe PF: > { %s17_s28 = sadd.s32 1, %s837_s28   ;;  %s987_s24 = smov %s829_s26 }
 0x3ff   : > { %p14_p9 = scmp.ge.s32.totalorder %s17_s28, 6   ;;  %s988_s25 = smov %s833_s27 }
 0x400   : > { %s989_s26 = smov %s992_s29  ;;  %s990_s27 = smov %s996_s30 }
 0x401   :  { %16 = sbr.rel (!%p14_p9) target bundleno = 3 (0x3), region = 86 }

</bundles_post_ra>
